<compile_context>
chip_gen: v5e
topology: v5e:2x2
jax: 0.10.0
libtpu: 0.0.40
codegen_flags: <defaults>
</compile_context>

<pallas_src>
import jax
import jax.numpy as jnp
from jax import lax
from jax.experimental import pallas as pl
from jax.experimental.pallas import tpu as pltpu

_OUT_PAD = 128  # lane-dense padded width for the 3-wide output


def _rot_fc_kernel(x_ref, wc_ref, bnb_ref, w1_ref, b1_ref, w2_ref, b2_ref, o_ref):
    D = x_ref.shape[-1]                 # d_model
    R = wc_ref.shape[0] // 3            # tb * pred_len rows per tap
    mm_dtype = w1_ref.dtype             # matmul operand dtype (f32 or bf16)

    # ---- Conv1d(k=3, p=1) with BN scale folded: ONE block-diagonal MXU matmul
    # computes all 3 taps for every batch element of the tile at once. ----
    a = jnp.dot(wc_ref[...], x_ref[...], preferred_element_type=jnp.float32)  # (3R, D)
    a0 = a[0 * R:1 * R]   # pairs with x[..., d-1]
    a1 = a[1 * R:2 * R]   # pairs with x[..., d]
    a2 = a[2 * R:3 * R]   # pairs with x[..., d+1]

    # Output-shift formulation: shift/mask the per-tap results instead of
    # materializing shifted copies of x.  Rolls stay on the XLU; boundary masks
    # are constant (1, D) rows (no full-size iota / compare / select).
    lane = lax.broadcasted_iota(jnp.int32, (1, D), 1)
    m_lo = (lane != 0).astype(jnp.float32)        # zero the wrapped lane of roll(+1)
    m_hi = (lane != D - 1).astype(jnp.float32)    # zero the wrapped lane of roll(-1)
    y = (a1
         + m_lo * pltpu.roll(a0, shift=1, axis=1)
         + m_hi * pltpu.roll(a2, shift=D - 1, axis=1))

    # BatchNorm shift (scale already folded into the conv weights) + SiLU.
    y = y + bnb_ref[...]
    y = y * jax.nn.sigmoid(y)

    # Linear(D, D) + SiLU as one (R, D) @ (D, D) matmul for the whole tile.
    z = jnp.dot(y.astype(mm_dtype), w1_ref[...],
                preferred_element_type=jnp.float32) + b1_ref[...]
    z = z * jax.nn.sigmoid(z)

    # Linear(D, 3), zero-padded to 128 output lanes -> unmasked lane-dense store.
    out = jnp.dot(z.astype(mm_dtype), w2_ref[...],
                  preferred_element_type=jnp.float32) + b2_ref[...]
    o_ref[...] = out.astype(o_ref.dtype)


def _num_tensorcores():
    """Best-effort TensorCores-per-chip: v5e/v6e -> 1, v3/v4/v5p/v7x -> 2."""
    try:
        kind = getattr(jax.devices()[0], "device_kind", "").lower()
    except Exception:
        return 1
    if any(v in kind for v in ("v7", "v4", "v3")):
        return 2
    if "v5" in kind and "lite" not in kind and "v5e" not in kind:
        return 2  # v5p
    return 1      # v5e, v6e, unknown -> safe default (single grid step)


def _pick_tb(B, P, num_cores, target_rows=256):
    """Batch tile size.

    Single-TC chips: one grid step (tb = B) unless tb*P already exceeds the MXU-row
    target (caps the O(tb^2) block-diagonal conv weight for large batches).
    Dual-TC chips: >= num_cores steps so the 'parallel' grid axis shards across
    TensorCores.  Prefer tb*P a multiple of 8 (sublane-aligned flattened rows).
    """
    divisors = [t for t in range(1, B + 1) if B % t == 0]
    aligned = [t for t in divisors if (t * P) % 8 == 0] or divisors
    min_steps = max(num_cores, 1)
    cands = [t for t in aligned if B // t >= min_steps] or aligned
    big_enough = [t for t in cands if t * P >= target_rows]
    return min(big_enough) if big_enough else max(cands)


def rot_fc_forward(x, conv_w, bn_gamma, bn_beta, bn_mean, bn_var,
                   w1, b1, w2, b2, *, eps=1e-5, tb=None,
                   matmul_dtype=jnp.float32):
    """x: (B, S, D). conv_w: (P, S, 3) (PyTorch Conv1d weight). Returns (B, P, 3).

    matmul_dtype=jnp.bfloat16 enables bf16 MXU operands (f32 accumulation) on
    v6e/v7x; keep f32 when tight (<=2e-3) numerical agreement is required.
    """
    B, S, D = x.shape
    P = conv_w.shape[0]
    n_out = w2.shape[0]                                   # = 3

    if tb is None:
        tb = _pick_tb(B, P, _num_tensorcores())
    assert B % tb == 0, "batch tile must divide the batch"

    # Fold BatchNorm (eval-mode running stats) into the conv weights + a shift.
    scale = bn_gamma / jnp.sqrt(bn_var + eps)             # (P,)
    shift = bn_beta - bn_mean * scale                     # (P,)
    wc = jnp.transpose(conv_w, (2, 0, 1)) * scale[None, :, None]      # (3, P, S)

    # Block-diagonal tap weight: wc_big[(t*tb + b)*P + p, b*S + s] = wc[t, p, s].
    # One (3*tb*P, tb*S) @ (tb*S, D) matmul then computes all taps for the tile.
    eye_b = jnp.eye(tb, dtype=jnp.float32)                              # (tb, tb)
    wc_big = jnp.einsum('tps,bc->tbpcs', wc, eye_b)                     # (3,tb,P,tb,S)
    wc_big = wc_big.reshape(3 * tb * P, tb * S).astype(matmul_dtype)

    # Per-row BN shift (row = b*P + p -> shift[p]).
    bnb = jnp.tile(shift.reshape(P, 1), (tb, 1)).astype(jnp.float32)    # (tb*P, 1)

    w1t = w1.T.astype(matmul_dtype)                                     # (D, D)
    b1r = b1.reshape(1, D).astype(jnp.float32)
    w2t = jnp.zeros((D, _OUT_PAD), matmul_dtype).at[:, :n_out].set(
        w2.T.astype(matmul_dtype))                                      # (D, 128)
    b2r = jnp.zeros((1, _OUT_PAD), jnp.float32).at[:, :n_out].set(b2.reshape(1, -1))

    # Flatten x to (B*S, D): lane dim untouched -> free reshape; kernel tiles are
    # directly the 2-D matmul operand.
    x2 = x.reshape(B * S, D).astype(matmul_dtype)

    grid_spec = pltpu.PrefetchScalarGridSpec(
        num_scalar_prefetch=0,
        grid=(B // tb,),
        in_specs=[
            pl.BlockSpec((tb * S, D), lambda b: (b, 0)),             # x batch tile (flat)
            pl.BlockSpec((3 * tb * P, tb * S), lambda b: (0, 0)),    # block-diag conv wt
            pl.BlockSpec((tb * P, 1), lambda b: (0, 0)),             # BN shift per row
            pl.BlockSpec((D, D), lambda b: (0, 0)),                  # W1^T
            pl.BlockSpec((1, D), lambda b: (0, 0)),                  # b1
            pl.BlockSpec((D, _OUT_PAD), lambda b: (0, 0)),           # W2^T (lane-padded)
            pl.BlockSpec((1, _OUT_PAD), lambda b: (0, 0)),           # b2  (lane-padded)
        ],
        out_specs=pl.BlockSpec((tb * P, _OUT_PAD), lambda b: (b, 0)),
    )

    out2 = pl.pallas_call(
        _rot_fc_kernel,
        out_shape=jax.ShapeDtypeStruct((B * P, _OUT_PAD), jnp.float32),
        grid_spec=grid_spec,
        compiler_params=pltpu.CompilerParams(
            dimension_semantics=("parallel",)),
    )(x2, wc_big, bnb, w1t, b1r, w2t, b2r)

    # Slice the 3 meaningful lanes back out (tiny post-processing op).
    return out2.reshape(B, P, _OUT_PAD)[..., :n_out]


def rot_fc_reference(x, conv_w, bn_gamma, bn_beta, bn_mean, bn_var,
                     w1, b1, w2, b2, eps=1e-5):
    """Plain-JAX reference of the same math (eval-mode BatchNorm)."""
    B, S, D = x.shape
    xp = jnp.pad(x, ((0, 0), (0, 0), (1, 1)))
    y = sum(jnp.einsum('ps,bsd->bpd', conv_w[:, :, t], xp[:, :, t:t + D])
            for t in range(3))
    scale = bn_gamma / jnp.sqrt(bn_var + eps)
    y = y * scale[None, :, None] + (bn_beta - bn_mean * scale)[None, :, None]
    y = y * jax.nn.sigmoid(y)
    z = jnp.einsum('bpd,ed->bpe', y, w1) + b1
    z = z * jax.nn.sigmoid(z)
    return jnp.einsum('bpd,ed->bpe', z, w2) + b2


if __name__ == "__main__":
    B, SEQ_LEN, PRED_LEN, D_MODEL = 8, 8, 4, 128

    key = jax.random.PRNGKey(0)
    ks = jax.random.split(key, 10)

    x = jax.random.normal(ks[0], (B, SEQ_LEN, D_MODEL), dtype=jnp.float32)

    # Conv1d(seq_len -> pred_len, k=3) weight: (P, S, 3), no bias.
    conv_w = 0.1 * jax.random.normal(ks[1], (PRED_LEN, SEQ_LEN, 3), jnp.float32)

    # BatchNorm1d(pred_len), eval-mode running statistics.
    gamma = 1.0 + 0.05 * jax.random.normal(ks[2], (PRED_LEN,), jnp.float32)
    beta = 0.05 * jax.random.normal(ks[3], (PRED_LEN,), jnp.float32)
    run_mean = 0.05 * jax.random.normal(ks[4], (PRED_LEN,), jnp.float32)
    run_var = 0.5 + jnp.abs(jax.random.normal(ks[5], (PRED_LEN,), jnp.float32))

    # Linear(d_model, d_model) and Linear(d_model, 3): y = x @ W^T + b.
    w1 = 0.1 * jax.random.normal(ks[6], (D_MODEL, D_MODEL), jnp.float32)
    b1 = 0.05 * jax.random.normal(ks[7], (D_MODEL,), jnp.float32)
    w2 = 0.1 * jax.random.normal(ks[8], (3, D_MODEL), jnp.float32)
    b2 = 0.05 * jax.random.normal(ks[9], (3,), jnp.float32)

    out = rot_fc_forward(x, conv_w, gamma, beta, run_mean, run_var, w1, b1, w2, b2)
    out = jax.block_until_ready(out)

    ref = rot_fc_reference(x, conv_w, gamma, beta, run_mean, run_var, w1, b1, w2, b2)
    assert out.shape == (B, PRED_LEN, 3)
    assert jnp.allclose(out, ref, atol=2e-3, rtol=2e-3), "mismatch vs reference"

    print("KERNEL_OK")
</pallas_src>

<mosaic_0001>
module attributes {stable_mosaic.version = 11 : i64} {
  func.func @_rot_fc_kernel(%arg0: i32, %arg1: memref<64x128xf32, #tpu.memory_space<vmem>>, %arg2: memref<96x64xf32, #tpu.memory_space<vmem>>, %arg3: memref<32x1xf32, #tpu.memory_space<vmem>>, %arg4: memref<128x128xf32, #tpu.memory_space<vmem>>, %arg5: memref<1x128xf32, #tpu.memory_space<vmem>>, %arg6: memref<128x128xf32, #tpu.memory_space<vmem>>, %arg7: memref<1x128xf32, #tpu.memory_space<vmem>>, %arg8: memref<32x128xf32, #tpu.memory_space<vmem>>) attributes {dimension_semantics = [#tpu.dimension_semantics<parallel>], iteration_bounds = array<i64: 1>, scalar_prefetch = 0 : i64, scratch_operands = 0 : i64, tpu.core_type = #tpu.core_type<tc>, window_params = [{transform_indices = @transform_0, window_bounds = array<i64: 64, 128>}, {pipeline_mode = #tpu.pipeline_mode<synchronous>, transform_indices = @transform_1, window_bounds = array<i64: 96, 64>}, {pipeline_mode = #tpu.pipeline_mode<synchronous>, transform_indices = @transform_2, window_bounds = array<i64: 32, 1>}, {pipeline_mode = #tpu.pipeline_mode<synchronous>, transform_indices = @transform_3, window_bounds = array<i64: 128, 128>}, {pipeline_mode = #tpu.pipeline_mode<synchronous>, transform_indices = @transform_4, window_bounds = array<i64: 1, 128>}, {pipeline_mode = #tpu.pipeline_mode<synchronous>, transform_indices = @transform_5, window_bounds = array<i64: 128, 128>}, {pipeline_mode = #tpu.pipeline_mode<synchronous>, transform_indices = @transform_6, window_bounds = array<i64: 1, 128>}, {transform_indices = @transform_7, window_bounds = array<i64: 32, 128>}]} {
    %c0 = arith.constant 0 : index
    %c0_0 = arith.constant 0 : index
    %0 = vector.load %arg2[%c0, %c0_0] : memref<96x64xf32, #tpu.memory_space<vmem>>, vector<96x64xf32>
    %c0_1 = arith.constant 0 : index
    %c0_2 = arith.constant 0 : index
    %1 = vector.load %arg1[%c0_1, %c0_2] : memref<64x128xf32, #tpu.memory_space<vmem>>, vector<64x128xf32>
    %cst = arith.constant dense<0.000000e+00> : vector<96x128xf32>
    %2 = tpu.matmul %0, %1, %cst {dimension_numbers = #tpu.dot_dimension_numbers<[1], [0], [0], [1], [0, 0, 1, 1], [], []>} : vector<96x64xf32>, vector<64x128xf32>, vector<96x128xf32> -> vector<96x128xf32>
    %3 = vector.extract_strided_slice %2 {offsets = [0, 0], sizes = [32, 128], strides = [1, 1]} : vector<96x128xf32> to vector<32x128xf32>
    %4 = vector.extract_strided_slice %2 {offsets = [32, 0], sizes = [32, 128], strides = [1, 1]} : vector<96x128xf32> to vector<32x128xf32>
    %5 = vector.extract_strided_slice %2 {offsets = [64, 0], sizes = [32, 128], strides = [1, 1]} : vector<96x128xf32> to vector<32x128xf32>
    %6 = tpu.iota {dimensions = array<i32: 1>} : vector<1x128xi32>
    %c0_i32 = arith.constant 0 : i32
    %7 = vector.broadcast %c0_i32 : i32 to vector<1x128xi32>
    %8 = arith.cmpi ne, %6, %7 : vector<1x128xi32>
    %9 = arith.extui %8 : vector<1x128xi1> to vector<1x128xi32>
    %10 = arith.sitofp %9 : vector<1x128xi32> to vector<1x128xf32>
    %c127_i32 = arith.constant 127 : i32
    %11 = vector.broadcast %c127_i32 : i32 to vector<1x128xi32>
    %12 = arith.cmpi ne, %6, %11 : vector<1x128xi32>
    %13 = arith.extui %12 : vector<1x128xi1> to vector<1x128xi32>
    %14 = arith.sitofp %13 : vector<1x128xi32> to vector<1x128xf32>
    %c1_i32 = arith.constant 1 : i32
    %15 = tpu.dynamic_rotate %3 by %c1_i32 dim 1 : vector<32x128xf32>, i32 -> vector<32x128xf32>
    %16 = vector.broadcast %10 : vector<1x128xf32> to vector<32x128xf32>
    %17 = arith.mulf %16, %15 : vector<32x128xf32>
    %18 = arith.addf %4, %17 : vector<32x128xf32>
    %c127_i32_3 = arith.constant 127 : i32
    %19 = tpu.dynamic_rotate %5 by %c127_i32_3 dim 1 : vector<32x128xf32>, i32 -> vector<32x128xf32>
    %20 = vector.broadcast %14 : vector<1x128xf32> to vector<32x128xf32>
    %21 = arith.mulf %20, %19 : vector<32x128xf32>
    %22 = arith.addf %18, %21 : vector<32x128xf32>
    %c0_4 = arith.constant 0 : index
    %c0_5 = arith.constant 0 : index
    %23 = vector.load %arg3[%c0_4, %c0_5] : memref<32x1xf32, #tpu.memory_space<vmem>>, vector<32x1xf32>
    %24 = vector.broadcast %23 : vector<32x1xf32> to vector<32x128xf32>
    %25 = arith.addf %22, %24 : vector<32x128xf32>
    %26 = arith.negf %25 : vector<32x128xf32>
    %27 = math.exp %26 : vector<32x128xf32>
    %cst_6 = arith.constant 1.000000e+00 : f32
    %28 = vector.broadcast %cst_6 : f32 to vector<32x128xf32>
    %29 = arith.addf %28, %27 : vector<32x128xf32>
    %30 = arith.divf %28, %29 : vector<32x128xf32>
    %31 = arith.mulf %25, %30 : vector<32x128xf32>
    %c0_7 = arith.constant 0 : index
    %c0_8 = arith.constant 0 : index
    %32 = vector.load %arg4[%c0_7, %c0_8] : memref<128x128xf32, #tpu.memory_space<vmem>>, vector<128x128xf32>
    %cst_9 = arith.constant dense<0.000000e+00> : vector<32x128xf32>
    %33 = tpu.matmul %31, %32, %cst_9 {dimension_numbers = #tpu.dot_dimension_numbers<[1], [0], [0], [1], [0, 0, 1, 1], [], []>} : vector<32x128xf32>, vector<128x128xf32>, vector<32x128xf32> -> vector<32x128xf32>
    %c0_10 = arith.constant 0 : index
    %c0_11 = arith.constant 0 : index
    %34 = vector.load %arg5[%c0_10, %c0_11] : memref<1x128xf32, #tpu.memory_space<vmem>>, vector<1x128xf32>
    %35 = vector.broadcast %34 : vector<1x128xf32> to vector<32x128xf32>
    %36 = arith.addf %33, %35 : vector<32x128xf32>
    %37 = arith.negf %36 : vector<32x128xf32>
    %38 = math.exp %37 : vector<32x128xf32>
    %cst_12 = arith.constant 1.000000e+00 : f32
    %39 = vector.broadcast %cst_12 : f32 to vector<32x128xf32>
    %40 = arith.addf %39, %38 : vector<32x128xf32>
    %41 = arith.divf %39, %40 : vector<32x128xf32>
    %42 = arith.mulf %36, %41 : vector<32x128xf32>
    %c0_13 = arith.constant 0 : index
    %c0_14 = arith.constant 0 : index
    %43 = vector.load %arg6[%c0_13, %c0_14] : memref<128x128xf32, #tpu.memory_space<vmem>>, vector<128x128xf32>
    %cst_15 = arith.constant dense<0.000000e+00> : vector<32x128xf32>
    %44 = tpu.matmul %42, %43, %cst_15 {dimension_numbers = #tpu.dot_dimension_numbers<[1], [0], [0], [1], [0, 0, 1, 1], [], []>} : vector<32x128xf32>, vector<128x128xf32>, vector<32x128xf32> -> vector<32x128xf32>
    %c0_16 = arith.constant 0 : index
    %c0_17 = arith.constant 0 : index
    %45 = vector.load %arg7[%c0_16, %c0_17] : memref<1x128xf32, #tpu.memory_space<vmem>>, vector<1x128xf32>
    %46 = vector.broadcast %45 : vector<1x128xf32> to vector<32x128xf32>
    %47 = arith.addf %44, %46 : vector<32x128xf32>
    %c0_18 = arith.constant 0 : index
    %c0_19 = arith.constant 0 : index
    %48 = vector.load %arg8[%c0_18, %c0_19] : memref<32x128xf32, #tpu.memory_space<vmem>>, vector<32x128xf32>
    tpu.vector_store %arg8[%c0_18, %c0_19], %47 {strides = array<i32>} : memref<32x128xf32, #tpu.memory_space<vmem>>, vector<32x128xf32>,
    return
  }
  func.func @transform_0(%arg0: i32) -> (i32, i32) {
    %c0_i32 = arith.constant 0 : i32
    %c0_i32_0 = arith.constant 0 : i32
    return %arg0, %c0_i32 : i32, i32
  }
  func.func @transform_1(%arg0: i32) -> (i32, i32) {
    %c0_i32 = arith.constant 0 : i32
    %c0_i32_0 = arith.constant 0 : i32
    %c0_i32_1 = arith.constant 0 : i32
    return %c0_i32, %c0_i32_0 : i32, i32
  }
  func.func @transform_2(%arg0: i32) -> (i32, i32) {
    %c0_i32 = arith.constant 0 : i32
    %c0_i32_0 = arith.constant 0 : i32
    %c0_i32_1 = arith.constant 0 : i32
    return %c0_i32, %c0_i32_0 : i32, i32
  }
  func.func @transform_3(%arg0: i32) -> (i32, i32) {
    %c0_i32 = arith.constant 0 : i32
    %c0_i32_0 = arith.constant 0 : i32
    %c0_i32_1 = arith.constant 0 : i32
    return %c0_i32, %c0_i32_0 : i32, i32
  }
  func.func @transform_4(%arg0: i32) -> (i32, i32) {
    %c0_i32 = arith.constant 0 : i32
    %c0_i32_0 = arith.constant 0 : i32
    %c0_i32_1 = arith.constant 0 : i32
    return %c0_i32, %c0_i32_0 : i32, i32
  }
  func.func @transform_5(%arg0: i32) -> (i32, i32) {
    %c0_i32 = arith.constant 0 : i32
    %c0_i32_0 = arith.constant 0 : i32
    %c0_i32_1 = arith.constant 0 : i32
    return %c0_i32, %c0_i32_0 : i32, i32
  }
  func.func @transform_6(%arg0: i32) -> (i32, i32) {
    %c0_i32 = arith.constant 0 : i32
    %c0_i32_0 = arith.constant 0 : i32
    %c0_i32_1 = arith.constant 0 : i32
    return %c0_i32, %c0_i32_0 : i32, i32
  }
  func.func @transform_7(%arg0: i32) -> (i32, i32) {
    %c0_i32 = arith.constant 0 : i32
    %c0_i32_0 = arith.constant 0 : i32
    return %arg0, %c0_i32 : i32, i32
  }
}

</mosaic_0001>

<bundles_post_ra>
// kernel: tpu_custom_call.1
= control target key start
LH: loop header
LB: loop body
LE: loop exit
PB: predicated region body
PF: predicated region fallthrough
CT: control target
= control target key end

     0   :  { %12 = vsyncpa [#allocation3], 0  ;;  %s855_s0 = inlined_call_operand.vmem [shape: f32[64,128], index: 0, kind: input, shape index: {}]   ;;  %s856_s1 = inlined_call_operand.vmem [shape: f32[96,64], index: 1, kind: input, shape index: {}]   ;;  %s857_s2 = inlined_call_operand.vmem [shape: f32[32,1], index: 2, kind: input, shape index: {}]   ;;  %s858_s3 = inlined_call_operand.vmem [shape: f32[128,128], index: 3, kind: input, shape index: {}]   ;;  %s859_s4 = inlined_call_operand.vmem [shape: f32[1,128], index: 4, kind: input, shape index: {}]   ;;  %s860_s5 = inlined_call_operand.hbm [shape: f32[128,128], index: 5, kind: input, shape index: {}]   ;;  %s861_s6 = inlined_call_operand.vmem [shape: f32[1,128], index: 6, kind: input, shape index: {}]   ;;  %s862_s7 = inlined_call_operand.hbm [shape: f32[32,128], index: 7, kind: output, shape index: {}]  }
   0x1   :  { %13 = vsyncpa [#allocation4], 0  ;;  %s28_s26 = sshll.u32 %s860_s5, 4  ;;  %s629_s27 = smov [#allocation2]   ;;  %s29_s26 = int_to_ptr.hbm [resolvable:$true] %s28_s26 }
   0x2   :  { %s30_s28 = sshll.u32 %s629_s27, 4  ;;  %s630_s29 = smov 128   ;;  %s31_s28 = int_to_ptr.vmem [resolvable:$true] %s30_s28 }
   0x3   :  { %s631_s30 = smov 8  }
   0x4   :  { %36 = dma.hbm_to_vmem [thread:$0]  %s29_s26, 2048, %s31_s28, [#allocation3], %s630_s29, %s630_s29, %s631_s30  }
   0x5   :  { %625 = dma.done.wait [#allocation3], 2048  }
   0x6   :  { %626 = vsyncadd [#allocation3], 4294965248  ;;  %v62_v0 = vld [vmem:[%s855_s0 + $0x38] sm:$0xff]  ;;  %v61_v1 = vld [vmem:[%s855_s0 + $0x30] sm:$0xff]  ;;  %vm63_vm0 = vcmask 523264   ;;  %v632_v12 = vmov 0   ;;  %v153_v37 = vlaneseq }
   0x7   :  { %108 = vmatpush.msra.mxu0 %v62_v0  ;;  %524 = vmatpush.msra.mxu3 %v62_v0  ;;  %v60_v2 = vld [vmem:[%s855_s0 + $0x28] sm:$0xff]  ;;  %v59_v3 = vld [vmem:[%s855_s0 + $0x20] sm:$0xff]  ;;  %v58_v4 = vld [vmem:[%s855_s0 + $0x18] sm:$0xff]  ;;  %s633_s26 = smov 1   ;;  %s634_s27 = smov 127   ;;  %v635_v46 = vmov 0.0  }
   0x8   :  { %v57_v5 = vld [vmem:[%s855_s0 + $0x10] sm:$0xff]  ;;  %v56_v6 = vld [vmem:[%s855_s0 + $0x8] sm:$0xff]  ;;  %v55_v7 = vld [vmem:[%s855_s0] sm:$0xff]  ;;  %540 = vset.pattern.permute.xlu1 %v632_v12  ;;  %541 = vset.pattern.permute.xlu2 %v632_v12  ;;  %v154_v41 = vand.u32 127, %v153_v37  ;;  %s636_s18 = smov [#allocation5]   ;;  %s489_s22 = sshll.u32 %s862_s7, 4  ;;  %s490_s22 = int_to_ptr.hbm [resolvable:$true] %s489_s22 }
   0x9   :  { %109 = vmatpush.msra.mxu0 %v61_v1  ;;  %525 = vmatpush.msra.mxu3 %v61_v1  ;;  %v43_v8 = vld [vmem:[%s856_s1] sm:$0xff]  ;;  %v49_v9 = vld [vmem:[%s856_s1 + $0x30] sm:$0xff]  ;;  %v44_v10 = vld [vmem:[%s856_s1 + $0x8] sm:$0xff]  ;;  %s487_s19 = sshll.u32 %s636_s18, 4  ;;  %s488_s19 = int_to_ptr.vmem [resolvable:$true] %s487_s19 }
   0xa   :  { %v50_v11 = vld [vmem:[%s856_s1 + $0x38] sm:$0xff]  ;;  %542 = vset.pattern.permute.xlu0 %v632_v12  ;;  %v51_v13 = vld [vmem:[%s856_s1 + $0x40] sm:$0xff]  ;;  %v45_v14 = vld [vmem:[%s856_s1 + $0x10] sm:$0xff]  ;;  %vm155_vm1 = vcmp.ne.s32.totalorder %v154_v41, 0  ;;  %vm158_vm2 = vcmp.ne.s32.totalorder %v154_v41, 127 }
   0xb   :  { %110 = vmatpush.msra.mxu0 %v60_v2  ;;  %526 = vmatpush.msra.mxu3 %v60_v2  ;;  %v52_v15 = vld [vmem:[%s856_s1 + $0x48] sm:$0xff]  ;;  %v46_v16 = vld [vmem:[%s856_s1 + $0x18] sm:$0xff]  ;;  %v53_v17 = vld [vmem:[%s856_s1 + $0x50] sm:$0xff]  ;;  %v514_v47 = vsel %vm155_vm1, 1.0, %v635_v46  ;;  %v789_v48 = vsel %vm158_vm2, 1.0, %v635_v46 }
   0xc   :  { %v47_v18 = vld [vmem:[%s856_s1 + $0x20] sm:$0xff]  ;;  %v54_v19 = vld [vmem:[%s856_s1 + $0x58] sm:$0xff]  ;;  %v48_v20 = vld [vmem:[%s856_s1 + $0x28] sm:$0xff] }
   0xd   :  { %111 = vmatpush.msra.mxu0 %v59_v3  ;;  %527 = vmatpush.msra.mxu3 %v59_v3  ;;  %v193_v21 = vld [vmem:[%s857_s2] sm:$0xff]  ;;  %v194_v29 = vld [vmem:[%s857_s2 + $0x8] sm:$0xff]  ;;  %v195_v32 = vld [vmem:[%s857_s2 + $0x10] sm:$0xff] }
   0xe   :  { %199 = vperm.xlu1 %540, %v193_v21   ;;  %v196_v34 = vld [vmem:[%s857_s2 + $0x18] sm:$0xff]  ;;  %v315_v36 = vld [vmem:[%s858_s3 + $0x70] sm:$0xff]  ;;  %v314_v40 = vld [vmem:[%s858_s3 + $0x68] sm:$0xff] }
   0xf   :  { %112 = vmatpush.msra.mxu0 %v58_v4  ;;  %528 = vmatpush.msra.mxu3 %v58_v4  ;;  %v316_v35 = vld [vmem:[%s858_s3 + $0x78] sm:$0xff]  ;;  %v313_v42 = vld [vmem:[%s858_s3 + $0x60] sm:$0xff]  ;;  %v311_v44 = vld [vmem:[%s858_s3 + $0x50] sm:$0xff] }
  0x10   :  { %321 = vmatpush.msra.mxu1 %v316_v35  ;;  %v312_v43 = vld [vmem:[%s858_s3 + $0x58] sm:$0xff]  ;;  %v310_v51 = vld [vmem:[%s858_s3 + $0x48] sm:$0xff]  ;;  %v309_v53 = vld [vmem:[%s858_s3 + $0x40] sm:$0xff] }
  0x11   :  { %113 = vmatpush.msra.mxu0 %v57_v5  ;;  %529 = vmatpush.msra.mxu3 %v57_v5  ;;  %v308_v54 = vld [vmem:[%s858_s3 + $0x38] sm:$0xff]  ;;  %v307_v58 = vld [vmem:[%s858_s3 + $0x30] sm:$0xff]  ;;  %v306_v62 = vld [vmem:[%s858_s3 + $0x28] sm:$0xff] }
  0x12   :  { %322 = vmatpush.msra.mxu1 %v315_v36  ;;  %v305_v0 = vld [vmem:[%s858_s3 + $0x20] sm:$0xff]  ;;  %v304_v1 = vld [vmem:[%s858_s3 + $0x18] sm:$0xff]  ;;  %v303_v3 = vld [vmem:[%s858_s3 + $0x10] sm:$0xff] }
  0x13   :  { %114 = vmatpush.msra.mxu0 %v56_v6  ;;  %530 = vmatpush.msra.mxu3 %v56_v6  ;;  %v302_v5 = vld [vmem:[%s858_s3 + $0x8] sm:$0xff] }
  0x14   :  { %323 = vmatpush.msra.mxu1 %v314_v40 }
  0x15   :  { %115 = vmatpush.msra.mxu0 %v55_v7  ;;  %531 = vmatpush.msra.mxu3 %v55_v7 }
  0x16   :  { %502 = vmatmul.msk.f32.vlgmr.msra.gmra.mxu0 %vm63_vm0, %v43_v8  ;;  %508 = vmatmul.msk.f32.vlgmr.msra.gmra.mxu3 %vm63_vm0, %v49_v9  ;;  %v301_v8 = vld [vmem:[%s858_s3] sm:$0xff] }
  0x17   :  { %324 = vmatpush.msra.mxu1 %v313_v42 }
  0x19   :  { %325 = vmatpush.msra.mxu1 %v312_v43 }
  0x1b   :  { %326 = vmatpush.msra.mxu1 %v311_v44 }
  0x1d   :  { %327 = vmatpush.msra.mxu1 %v310_v51 }
  0x1e   :  { %503 = vmatmul.msk.f32.gmra.mxu0 %vm63_vm0, %v44_v10  ;;  %509 = vmatmul.msk.f32.gmra.mxu3 %vm63_vm0, %v50_v11 }
  0x1f   :  { %328 = vmatpush.msra.mxu1 %v309_v53 }
  0x21   :  { %329 = vmatpush.msra.mxu1 %v308_v54 }
  0x23   :  { %330 = vmatpush.msra.mxu1 %v307_v58 }
  0x25   :  { %331 = vmatpush.msra.mxu1 %v306_v62 }
  0x26   :  { %510 = vmatmul.msk.f32.gmra.mxu3 %vm63_vm0, %v51_v13  ;;  %504 = vmatmul.msk.f32.gmra.mxu0 %vm63_vm0, %v45_v14 }
  0x27   :  { %332 = vmatpush.msra.mxu1 %v305_v0 }
  0x29   :  { %333 = vmatpush.msra.mxu1 %v304_v1 }
  0x2b   :  { %334 = vmatpush.msra.mxu1 %v303_v3 }
  0x2d   :  { %335 = vmatpush.msra.mxu1 %v302_v5 }
  0x2e   :  { %511 = vmatmul.msk.f32.gmra.mxu3 %vm63_vm0, %v52_v15  ;;  %505 = vmatmul.msk.f32.gmra.mxu0 %vm63_vm0, %v46_v16 }
  0x2f   :  { %336 = vmatpush.msra.mxu1 %v301_v8 }
  0x36   :  { %512 = vmatmul.msk.f32.gmra.mxu3 %vm63_vm0, %v53_v17  ;;  %506 = vmatmul.msk.f32.gmra.mxu0 %vm63_vm0, %v47_v18 }
  0x3e   :  { %513 = vmatmul.msk.f32.gmra.mxu3 %vm63_vm0, %v54_v19  ;;  %507 = vmatmul.msk.f32.gmra.mxu0 %vm63_vm0, %v48_v20 }
  0x80   :  { %v200_v38 = vpop.permute.xlu1 %199 }
  0x93   :  { %v117_v22 = vpop.f32.mrf.mxu0 }
  0x94   :  { %161 = vrot.lane.b32.xlu0 %v117_v22, %s633_s26 }
  0x99   :  { %v758_v23 = vpop.f32.mrf.mxu3 }
  0x9b   :  { %v120_v24 = vpop.f32.mrf.mxu0 }
  0x9c   :  { %163 = vrot.lane.b32.xlu1 %v120_v24, %s633_s26 }
  0xa1   :  { %v760_v25 = vpop.f32.mrf.mxu3 }
  0xa3   :  { %v123_v27 = vpop.f32.mrf.mxu0 }
  0xa9   :  { %v141_v26 = vpop.f32.mrf.mxu3 }
  0xaa   :  { %177 = vrot.lane.b32.xlu0 %v141_v26, %s634_s27 }
  0xab   :  { %v126_v30 = vpop.f32.mrf.mxu0 }
  0xb1   :  { %v144_v28 = vpop.f32.mrf.mxu3 }
  0xb2   :  { %179 = vrot.lane.b32.xlu2 %v144_v28, %s634_s27  ;;  %165 = vrot.lane.b32.xlu0 %v123_v27, %s633_s26 }
  0xb3   :  { %v129_v39 = vpop.f32.mrf.mxu0 }
  0xb9   :  { %v147_v31 = vpop.f32.mrf.mxu3 }
  0xba   :  { %204 = vperm.xlu2 %541, %v194_v29   ;;  %181 = vrot.lane.b32.xlu1 %v147_v31, %s634_s27 }
  0xbb   :  { %167 = vrot.lane.b32.xlu0 %v126_v30, %s633_s26  ;;  %v132_v50 = vpop.f32.mrf.mxu0 }
  0xc1   :  { %v150_v33 = vpop.f32.mrf.mxu3 }
  0xc2   :  { %183 = vrot.lane.b32.xlu1 %v150_v33, %s634_s27  ;;  %209 = vperm.xlu2 %541, %v195_v32  }
  0xca   :  { %214 = vperm.xlu2 %541, %v196_v34  }
 0x106   :  { %v162_v57 = vpop.permute.xlu0 %161 }
 0x107   :  { %v169_v2 = vmul.f32 %v514_v47, %v162_v57 }
 0x109   :  { %v173_v6 = vadd.f32 %v169_v2, %v129_v39 }
 0x10c   :  { %v180_v45 = vpop.permute.xlu2 %179 }
 0x10d   :  { %v186_v55 = vmul.f32 %v789_v48, %v180_v45 }
 0x10e   :  { %v164_v49 = vpop.permute.xlu1 %163 }
 0x10f   :  { %v170_v52 = vmul.f32 %v514_v47, %v164_v49 }
 0x111   :  { %v174_v56 = vadd.f32 %v170_v52, %v132_v50 }
 0x113   :  { %v190_v59 = vadd.f32 %v186_v55, %v174_v56 }
 0x114   :  { %v205_v60 = vpop.permute.xlu2 %204 }
 0x115   :  { %v804_v61 = vadd.f32 %v205_v60, %v190_v59 }
 0x117   :  { %v517_v63 = vmul.f32 -1.442695, %v804_v61 }
 0x119   :  { %545 = vpow2.f32 %v517_v63 }
 0x11c   :  { %v178_v4 = vpop.permute.xlu0 %177  ;;  %v210_v22 = vpop.permute.xlu2 %209 }
 0x11d   :  { %v185_v7 = vmul.f32 %v789_v48, %v178_v4 }
 0x11f   :  { %v189_v9 = vadd.f32 %v185_v7, %v173_v6  ;;  %v546_v10 = vpop.eup %545 }
 0x120   :  { %v234_v12 = vadd.f32 1.0, %v546_v10 }
 0x121   :  { %v217_v11 = vadd.f32 %v200_v38, %v189_v9 }
 0x122   :  { %v263_v51 = vand.u32 2147483648, %v234_v12  ;;  %vm257_vm8 = vweird.f32 %v234_v12  ;;  %v261_v53 = vand.u32 2147483647, %v234_v12 }
 0x123   :  { %v516_v13 = vmul.f32 -1.442695, %v217_v11 }
 0x124   :  { %v166_v14 = vpop.permute.xlu0 %165  ;;  %v215_v38 = vpop.permute.xlu2 %214  ;;  %v264_v55 = vor.u32 1.1754944e-38, %v263_v51  ;;  %vm262_vm10 = vcmp.eq.f32.partialorder %v261_v53, 8.507059e+37 }
 0x125   :  { %547 = vpow2.f32 %v516_v13  ;;  %v171_v15 = vmul.f32 %v514_v47, %v166_v14 }
 0x126   :  { %549 = vrcp.f32 %v234_v12 }
 0x127   :  { %v175_v20 = vadd.f32 %v171_v15, %v758_v23 }
 0x12b   :  { %v548_v16 = vpop.eup %547 }
 0x12c   :  { %v182_v17 = vpop.permute.xlu1 %181  ;;  %v233_v18 = vadd.f32 1.0, %v548_v16  ;;  %v550_v19 = vpop.eup %549 }
 0x12d   :  { %v187_v21 = vmul.f32 %v789_v48, %v182_v17  ;;  %v168_v24 = vpop.permute.xlu0 %167  ;;  %v253_v27 = vmul.f32 %v550_v19, %v234_v12  ;;  %vm258_vm6 = vweird.f32 %v550_v19 }
 0x12e   :  { %551 = vrcp.f32 %v233_v18  ;;  %v172_v28 = vmul.f32 %v514_v47, %v168_v24  ;;  %v248_v39 = vand.u32 2147483648, %v233_v18  ;;  %v246_v42 = vand.u32 2147483647, %v233_v18  ;;  %vm259_vm9 = vmor %vm257_vm8, %vm258_vm6  ;;  %v440_v24 = vld [vmem:[#allocation2 + $0x50] sm:$0xff] }
 0x12f   :  { %v191_v26 = vadd.f32 %v187_v21, %v175_v20  ;;  %v254_v33 = vsub.f32 1.0, %v253_v27  ;;  %vm242_vm4 = vweird.f32 %v233_v18  ;;  %v443_v20 = vld [vmem:[#allocation2 + $0x68] sm:$0xff]  ;;  %v442_v21 = vld [vmem:[#allocation2 + $0x60] sm:$0xff] }
 0x130   :  { %v176_v34 = vadd.f32 %v172_v28, %v760_v25  ;;  %v249_v47 = vor.u32 1.1754944e-38, %v248_v39  ;;  %vm247_vm7 = vcmp.eq.f32.partialorder %v246_v42, 8.507059e+37  ;;  %v438_v27 = vld [vmem:[#allocation2 + $0x40] sm:$0xff]  ;;  %v437_v28 = vld [vmem:[#allocation2 + $0x38] sm:$0xff] }
 0x131   :  { %v828_v29 = vadd.f32 %v210_v22, %v191_v26  ;;  %v255_v40 = vmul.f32 %v550_v19, %v254_v33  ;;  %v441_v22 = vld [vmem:[#allocation2 + $0x58] sm:$0xff]  ;;  %v439_v26 = vld [vmem:[#allocation2 + $0x48] sm:$0xff]  ;;  %v432_v33 = vld [vmem:[#allocation2 + $0x10] sm:$0xff] }
 0x133   :  { %v518_v30 = vmul.f32 -1.442695, %v828_v29  ;;  %v256_v49 = vadd.f32 %v550_v19, %v255_v40 }
 0x134   :  { %v552_v31 = vpop.eup %551  ;;  %v184_v32 = vpop.permute.xlu1 %183 }
 0x135   :  { %v188_v35 = vmul.f32 %v789_v48, %v184_v32  ;;  %v238_v23 = vmul.f32 %v552_v31, %v233_v18  ;;  %553 = vpow2.f32 %v518_v30  ;;  %vm243_vm3 = vweird.f32 %v552_v31  ;;  %v445_v18 = vld [vmem:[#allocation2 + $0x78] sm:$0xff]  ;;  %v435_v30 = vld [vmem:[#allocation2 + $0x28] sm:$0xff] }
 0x136   :  { %vm244_vm5 = vmor %vm242_vm4, %vm243_vm3  ;;  %v260_v54 = vsel %vm259_vm9, %v550_v19, %v256_v49  ;;  %450 = vmatpush.msra.mxu2 %v445_v18  ;;  %v444_v19 = vld [vmem:[#allocation2 + $0x70] sm:$0xff]  ;;  %v433_v32 = vld [vmem:[#allocation2 + $0x18] sm:$0xff] }
 0x137   :  { %v192_v36 = vadd.f32 %v188_v35, %v176_v34  ;;  %v239_v37 = vsub.f32 1.0, %v238_v23  ;;  %v265_v58 = vsel %vm262_vm10, %v264_v55, %v260_v54  ;;  %v543_v34 = vld [vmem:[%s859_s4] ss:$0 sm:$0xff]  ;;  %v431_v35 = vld [vmem:[#allocation2 + $0x8] sm:$0xff] }
 0x138   :  { %v298_v62 = vmul.f32 %v265_v58, %v804_v61  ;;  %451 = vmatpush.msra.mxu2 %v444_v19 }
 0x139   :  { %v240_v41 = vmul.f32 %v552_v31, %v239_v37  ;;  %v220_v43 = vadd.f32 %v215_v38, %v192_v36  ;;  %v430_v36 = vld [vmem:[#allocation2] sm:$0xff] }
 0x13a   :  { %452 = vmatpush.msra.mxu2 %v443_v20 }
 0x13b   :  { %v554_v44 = vpop.eup %553  ;;  %v241_v45 = vadd.f32 %v552_v31, %v240_v41  ;;  %v519_v46 = vmul.f32 -1.442695, %v220_v43 }
 0x13c   :  { %v235_v25 = vadd.f32 1.0, %v554_v44  ;;  %453 = vmatpush.msra.mxu2 %v442_v21 }
 0x13d   :  { %v245_v48 = vsel %vm244_vm5, %v552_v31, %v241_v45  ;;  %555 = vpow2.f32 %v519_v46  ;;  %v434_v31 = vld [vmem:[#allocation2 + $0x20] sm:$0xff] }
 0x13e   :  { %v250_v50 = vsel %vm247_vm7, %v249_v47, %v245_v48  ;;  %557 = vrcp.f32 %v235_v25  ;;  %v278_v0 = vand.u32 2147483648, %v235_v25  ;;  %v276_v2 = vand.u32 2147483647, %v235_v25  ;;  %454 = vmatpush.msra.mxu2 %v441_v22 }
 0x13f   :  { %v297_v52 = vmul.f32 %v250_v50, %v217_v11  ;;  %vm272_vm12 = vweird.f32 %v235_v25 }
 0x140   :  { %v279_v5 = vor.u32 1.1754944e-38, %v278_v0  ;;  %vm277_vm14 = vcmp.eq.f32.partialorder %v276_v2, 8.507059e+37  ;;  %455 = vmatpush.msra.mxu2 %v440_v24 }
 0x141   :  { %337 = vmatmul.f32.vlgmr.msra.gmra.mxu1 %v297_v52 }
 0x142   :  { %456 = vmatpush.msra.mxu2 %v439_v26 }
 0x143   :  { %v556_v56 = vpop.eup %555 }
 0x144   :  { %v558_v57 = vpop.eup %557  ;;  %v236_v59 = vadd.f32 1.0, %v556_v56  ;;  %457 = vmatpush.msra.mxu2 %v438_v27 }
 0x145   :  { %v268_v60 = vmul.f32 %v558_v57, %v235_v25  ;;  %vm273_vm11 = vweird.f32 %v558_v57 }
 0x146   :  { %559 = vrcp.f32 %v236_v59  ;;  %vm274_vm13 = vmor %vm272_vm12, %vm273_vm11  ;;  %v293_v11 = vand.u32 2147483648, %v236_v59  ;;  %v291_v12 = vand.u32 2147483647, %v236_v59  ;;  %vm287_vm0 = vweird.f32 %v236_v59  ;;  %458 = vmatpush.msra.mxu2 %v437_v28 }
 0x147   :  { %v269_v63 = vsub.f32 1.0, %v268_v60 }
 0x148   :  { %v294_v14 = vor.u32 1.1754944e-38, %v293_v11  ;;  %vm292_vm2 = vcmp.eq.f32.partialorder %v291_v12, 8.507059e+37 }
 0x149   :  { %340 = vmatmul.f32.gmra.mxu1 %v298_v62  ;;  %v270_v1 = vmul.f32 %v558_v57, %v269_v63 }
 0x14b   :  { %v271_v3 = vadd.f32 %v558_v57, %v270_v1 }
 0x14c   :  { %v560_v4 = vpop.eup %559 }
 0x14d   :  { %v275_v6 = vsel %vm274_vm13, %v558_v57, %v271_v3  ;;  %v283_v7 = vmul.f32 %v560_v4, %v236_v59  ;;  %vm288_vm15 = vweird.f32 %v560_v4 }
 0x14e   :  { %v280_v8 = vsel %vm277_vm14, %v279_v5, %v275_v6  ;;  %vm289_vm1 = vmor %vm287_vm0, %vm288_vm15 }
 0x14f   :  { %v299_v9 = vmul.f32 %v280_v8, %v828_v29  ;;  %v284_v10 = vsub.f32 1.0, %v283_v7  ;;  %v436_v29 = vld [vmem:[#allocation2 + $0x30] sm:$0xff] }
 0x150   :  { %459 = vmatpush.msra.mxu2 %v436_v29 }
 0x151   :  { %343 = vmatmul.f32.gmra.mxu1 %v299_v9  ;;  %v285_v61 = vmul.f32 %v560_v4, %v284_v10 }
 0x152   :  { %460 = vmatpush.msra.mxu2 %v435_v30 }
 0x153   :  { %v286_v13 = vadd.f32 %v560_v4, %v285_v61 }
 0x154   :  { %461 = vmatpush.msra.mxu2 %v434_v31 }
 0x155   :  { %v290_v15 = vsel %vm289_vm1, %v560_v4, %v286_v13 }
 0x156   :  { %v295_v16 = vsel %vm292_vm2, %v294_v14, %v290_v15  ;;  %462 = vmatpush.msra.mxu2 %v433_v32 }
 0x157   :  { %v300_v17 = vmul.f32 %v295_v16, %v220_v43 }
 0x158   :  { %463 = vmatpush.msra.mxu2 %v432_v33 }
 0x159   :  { %346 = vmatmul.f32.gmra.mxu1 %v300_v17 }
 0x15a   :  { %464 = vmatpush.msra.mxu2 %v431_v35 }
 0x15c   :  { %465 = vmatpush.msra.mxu2 %v430_v36  ;;  %v544_v36 = vld [vmem:[%s861_s6] ss:$0 sm:$0xff] }
 0x1be   :  { %v338_v23 = vpop.f32.mrf.mxu1 }
 0x1bf   :  { %v339_v37 = vadd.f32 %v543_v34, %v338_v23 }
 0x1c1   :  { %v520_v38 = vmul.f32 -1.442695, %v339_v37 }
 0x1c3   :  { %561 = vpow2.f32 %v520_v38 }
 0x1c6   :  { %v341_v39 = vpop.f32.mrf.mxu1 }
 0x1c7   :  { %v342_v40 = vadd.f32 %v543_v34, %v341_v39 }
 0x1c9   :  { %v562_v41 = vpop.eup %561  ;;  %v521_v42 = vmul.f32 -1.442695, %v342_v40 }
 0x1ca   :  { %v362_v43 = vadd.f32 1.0, %v562_v41 }
 0x1cb   :  { %563 = vpow2.f32 %v521_v42 }
 0x1cc   :  { %565 = vrcp.f32 %v362_v43  ;;  %v377_v52 = vand.u32 2147483648, %v362_v43  ;;  %v375_v55 = vand.u32 2147483647, %v362_v43  ;;  %vm371_vm4 = vweird.f32 %v362_v43 }
 0x1ce   :  { %v344_v44 = vpop.f32.mrf.mxu1  ;;  %v378_v62 = vor.u32 1.1754944e-38, %v377_v52  ;;  %vm376_vm6 = vcmp.eq.f32.partialorder %v375_v55, 8.507059e+37 }
 0x1cf   :  { %v838_v45 = vadd.f32 %v543_v34, %v344_v44 }
 0x1d1   :  { %v564_v46 = vpop.eup %563  ;;  %v522_v47 = vmul.f32 -1.442695, %v838_v45 }
 0x1d2   :  { %v566_v25 = vpop.eup %565  ;;  %v363_v48 = vadd.f32 1.0, %v564_v46 }
 0x1d3   :  { %567 = vpow2.f32 %v522_v47  ;;  %v367_v49 = vmul.f32 %v566_v25, %v362_v43  ;;  %vm372_vm3 = vweird.f32 %v566_v25 }
 0x1d4   :  { %569 = vrcp.f32 %v363_v48  ;;  %vm373_vm5 = vmor %vm371_vm4, %vm372_vm3  ;;  %v392_v4 = vand.u32 2147483648, %v363_v48  ;;  %v390_v6 = vand.u32 2147483647, %v363_v48  ;;  %vm386_vm8 = vweird.f32 %v363_v48 }
 0x1d5   :  { %v368_v50 = vsub.f32 1.0, %v367_v49 }
 0x1d6   :  { %v347_v51 = vpop.f32.mrf.mxu1  ;;  %v393_v11 = vor.u32 1.1754944e-38, %v392_v4  ;;  %vm391_vm10 = vcmp.eq.f32.partialorder %v390_v6, 8.507059e+37 }
 0x1d7   :  { %v841_v53 = vadd.f32 %v543_v34, %v347_v51  ;;  %v369_v54 = vmul.f32 %v566_v25, %v368_v50 }
 0x1d9   :  { %v568_v56 = vpop.eup %567  ;;  %v523_v57 = vmul.f32 -1.442695, %v841_v53  ;;  %v370_v58 = vadd.f32 %v566_v25, %v369_v54 }
 0x1da   :  { %v570_v59 = vpop.eup %569  ;;  %v364_v60 = vadd.f32 1.0, %v568_v56 }
 0x1db   :  { %571 = vpow2.f32 %v523_v57  ;;  %v374_v63 = vsel %vm373_vm5, %v566_v25, %v370_v58  ;;  %v382_v0 = vmul.f32 %v570_v59, %v363_v48  ;;  %vm387_vm7 = vweird.f32 %v570_v59 }
 0x1dc   :  { %573 = vrcp.f32 %v364_v60  ;;  %v379_v1 = vsel %vm376_vm6, %v378_v62, %v374_v63  ;;  %vm388_vm9 = vmor %vm386_vm8, %vm387_vm7  ;;  %v407_v16 = vand.u32 2147483648, %v364_v60  ;;  %v405_v18 = vand.u32 2147483647, %v364_v60 }
 0x1dd   :  { %v426_v2 = vmul.f32 %v379_v1, %v339_v37  ;;  %v383_v3 = vsub.f32 1.0, %v382_v0  ;;  %vm401_vm12 = vweird.f32 %v364_v60 }
 0x1de   :  { %v408_v21 = vor.u32 1.1754944e-38, %v407_v16  ;;  %vm406_vm14 = vcmp.eq.f32.partialorder %v405_v18, 8.507059e+37 }
 0x1df   :  { %466 = vmatmul.f32.vlgmr.msra.gmra.mxu2 %v426_v2  ;;  %v384_v5 = vmul.f32 %v570_v59, %v383_v3 }
 0x1e1   :  { %v572_v7 = vpop.eup %571  ;;  %v385_v8 = vadd.f32 %v570_v59, %v384_v5 }
 0x1e2   :  { %v574_v9 = vpop.eup %573  ;;  %v365_v10 = vadd.f32 1.0, %v572_v7 }
 0x1e3   :  { %v389_v61 = vsel %vm388_vm9, %v570_v59, %v385_v8  ;;  %v397_v12 = vmul.f32 %v574_v9, %v364_v60  ;;  %vm402_vm11 = vweird.f32 %v574_v9 }
 0x1e4   :  { %575 = vrcp.f32 %v365_v10  ;;  %v394_v13 = vsel %vm391_vm10, %v393_v11, %v389_v61  ;;  %vm403_vm13 = vmor %vm401_vm12, %vm402_vm11  ;;  %v422_v29 = vand.u32 2147483648, %v365_v10  ;;  %v420_v31 = vand.u32 2147483647, %v365_v10 }
 0x1e5   :  { %v427_v14 = vmul.f32 %v394_v13, %v342_v40  ;;  %v398_v15 = vsub.f32 1.0, %v397_v12  ;;  %vm416_vm0 = vweird.f32 %v365_v10 }
 0x1e6   :  { %v423_v33 = vor.u32 1.1754944e-38, %v422_v29  ;;  %vm421_vm2 = vcmp.eq.f32.partialorder %v420_v31, 8.507059e+37 }
 0x1e7   :  { %469 = vmatmul.f32.gmra.mxu2 %v427_v14  ;;  %v399_v17 = vmul.f32 %v574_v9, %v398_v15 }
 0x1e9   :  { %v400_v19 = vadd.f32 %v574_v9, %v399_v17 }
 0x1ea   :  { %v576_v20 = vpop.eup %575 }
 0x1eb   :  { %v404_v22 = vsel %vm403_vm13, %v574_v9, %v400_v19  ;;  %v412_v24 = vmul.f32 %v576_v20, %v365_v10  ;;  %vm417_vm15 = vweird.f32 %v576_v20 }
 0x1ec   :  { %v409_v26 = vsel %vm406_vm14, %v408_v21, %v404_v22  ;;  %vm418_vm1 = vmor %vm416_vm0, %vm417_vm15 }
 0x1ed   :  { %v428_v27 = vmul.f32 %v409_v26, %v838_v45  ;;  %v413_v28 = vsub.f32 1.0, %v412_v24 }
 0x1ef   :  { %472 = vmatmul.f32.gmra.mxu2 %v428_v27  ;;  %v414_v30 = vmul.f32 %v576_v20, %v413_v28 }
 0x1f1   :  { %v415_v32 = vadd.f32 %v576_v20, %v414_v30 }
 0x1f3   :  { %v419_v34 = vsel %vm418_vm1, %v576_v20, %v415_v32 }
 0x1f4   :  { %v424_v35 = vsel %vm421_vm2, %v423_v33, %v419_v34 }
 0x1f5   :  { %v429_v23 = vmul.f32 %v424_v35, %v841_v53 }
 0x1f7   :  { %475 = vmatmul.f32.gmra.mxu2 %v429_v23 }
 0x262   :  { %v467_v37 = vpop.f32.mrf.mxu2 }
 0x263   :  { %v468_v38 = vadd.f32 %v544_v36, %v467_v37 }
 0x265   :  { %479 = vst [vmem:[#allocation5] sm:$0xff] %v468_v38 }
 0x26a   :  { %v470_v39 = vpop.f32.mrf.mxu2 }
 0x26b   :  { %v471_v40 = vadd.f32 %v544_v36, %v470_v39 }
 0x26d   :  { %480 = vst [vmem:[#allocation5 + $0x8] sm:$0xff] %v471_v40 }
 0x272   :  { %v473_v41 = vpop.f32.mrf.mxu2 }
 0x273   :  { %v474_v42 = vadd.f32 %v544_v36, %v473_v41 }
 0x275   :  { %481 = vst [vmem:[#allocation5 + $0x10] sm:$0xff] %v474_v42 }
 0x27a   :  { %v476_v43 = vpop.f32.mrf.mxu2 }
 0x27b   :  { %v477_v44 = vadd.f32 %v544_v36, %v476_v43 }
 0x27d   :  { %482 = vst [vmem:[#allocation5 + $0x18] sm:$0xff] %v477_v44 }
 0x27e   :  { %495 = dma.vmem_to_hbm [thread:$0]  %s488_s19, 512, %s490_s22, [#allocation4], %s630_s29, %s630_s29, %s631_s30  }
 0x27f   :  { %627 = dma.done.wait [#allocation4], 512  }
 0x280   :  { %628 = vsyncadd [#allocation4], 4294966784 }
 0x281   :  { %500 = vsyncpa [#allocation3], 1 }
 0x282   :  { %501 = vsyncpa [#allocation4], 1 }

</bundles_post_ra>
